<compile_context>
chip_gen: v7x
topology: tpu7x:2x2x1
jax: 0.10.0
libtpu: 0.0.40
codegen_flags: <defaults>
</compile_context>

<pallas_src>
import functools

import jax
import jax.numpy as jnp
from jax.experimental import pallas as pl
from jax.experimental.pallas import tpu as pltpu


def _conv_extractor_kernel(x_ref, w_ref, b_ref, o_ref, *, seq_len, kernel_size,
                           out_len):
    """Per-batch-tile: pooled conv1d (same padding) via per-tap column sums.

    x_ref: (BT, L, C)  unpadded input rows for this batch tile
    w_ref: (K, C, H)   conv weights, tap-major
    b_ref: (1, H)      conv bias
    o_ref: (BT, H)     pooled output for this batch tile
    """
    L = seq_len
    K = kernel_size
    pad = K // 2
    BT = o_ref.shape[0]
    H = o_ref.shape[1]

    x = x_ref[...]                                     # (BT, L, C) f32
    # Single reduction over the sequence dim (XLU); edge corrections below.
    total = jnp.sum(x, axis=1)                         # (BT, C)

    acc = jnp.zeros((BT, H), dtype=jnp.float32)
    # K is tiny and static: unrolled Python loop.
    for k in range(K):
        # Valid input-row range that tap k contributes to across all
        # output positions l = 0 .. out_len-1 (zero padding outside [0, L-1]).
        lo = max(0, k - pad)
        hi = min(L - 1, out_len - 1 + k - pad)
        if lo > hi:
            continue
        s_k = total
        if lo > 0:                                     # drop first `lo` rows
            s_k = s_k - jnp.sum(x[:, :lo, :], axis=1)
        if hi < L - 1:                                 # drop last rows
            s_k = s_k - jnp.sum(x[:, hi + 1:, :], axis=1)
        acc = acc + jnp.dot(s_k, w_ref[k], preferred_element_type=jnp.float32)

    o_ref[...] = (acc * (1.0 / out_len) + b_ref[...]).astype(o_ref.dtype)


def _pick_batch_tile(B, L, C, *, bytes_per_elem=4, vmem_budget=4 << 20):
    """Batch rows per grid step: sublane-dense (>=8 / multiple of 8) and sized
    so a double-buffered x tile stays well under the default scoped VMEM limit
    on all of v5e / v6e / v7x."""
    if B <= 8:
        return B                                       # full dim -> legal block
    rows = max(8, vmem_budget // (L * C * bytes_per_elem))
    bt = min(B, (rows // 8) * 8)
    return max(8, bt)


def prepare_conv_params(weight, bias):
    """One-time param prep (hoisted out of the per-call path).

    weight: (H, C, K) PyTorch Conv1d layout -> (K, C, H) tap-major.
    bias:   (H,)                            -> (1, H).
    """
    w_kch = jnp.transpose(weight, (2, 1, 0)).astype(jnp.float32)
    b_2d = bias.astype(jnp.float32).reshape(1, -1)
    return w_kch, b_2d


def conv_extractor(x, w_kch, b_2d, *, kernel_size=3):
    """x: (B, L, C) f32; w_kch: (K, C, H) tap-major; b_2d: (1, H)."""
    B, L, C = x.shape
    K, C_w, H = w_kch.shape
    assert K == kernel_size and C_w == C
    pad = K // 2
    out_len = L + 2 * pad - K + 1   # == L for odd K; L + 1 for even K (PyTorch)

    BT = _pick_batch_tile(B, L, C)
    grid = (pl.cdiv(B, BT),)

    kernel = functools.partial(
        _conv_extractor_kernel, seq_len=L, kernel_size=K, out_len=out_len)

    out = pl.pallas_call(
        kernel,
        out_shape=jax.ShapeDtypeStruct((B, H), jnp.float32),
        grid_spec=pltpu.PrefetchScalarGridSpec(
            num_scalar_prefetch=0,
            grid=grid,
            in_specs=[
                pl.BlockSpec((BT, L, C), lambda b: (b, 0, 0)),   # batch tile of x
                pl.BlockSpec((K, C, H), lambda b: (0, 0, 0)),    # full weights
                pl.BlockSpec((1, H), lambda b: (0, 0)),          # bias
            ],
            out_specs=pl.BlockSpec((BT, H), lambda b: (b, 0)),
        ),
        compiler_params=pltpu.CompilerParams(
            dimension_semantics=("parallel",)),
    )(x, w_kch, b_2d)
    return out


def _reference(x, weight, bias, kernel_size=3):
    """Pure-JAX reference mirroring the PyTorch module."""
    pad = kernel_size // 2
    x_ncl = jnp.transpose(x, (0, 2, 1))
    y = jax.lax.conv_general_dilated(
        x_ncl, weight,
        window_strides=(1,), padding=[(pad, pad)],
        dimension_numbers=("NCH", "OIH", "NCH"))
    y = y + bias[None, :, None]
    return jnp.mean(y, axis=-1)   # (B, H)


if __name__ == "__main__":
    # Small, deterministic setup.
    B, L, C, H, K = 2, 8, 4, 32, 3
    key = jax.random.PRNGKey(0)
    kx, kw, kb = jax.random.split(key, 3)

    x = jax.random.normal(kx, (B, L, C), dtype=jnp.float32)
    # Conv1d params: weight (H, C, K), bias (H,) — deterministic synthetic init.
    weight = jax.random.normal(kw, (H, C, K), dtype=jnp.float32) * 0.1
    bias = jax.random.normal(kb, (H,), dtype=jnp.float32) * 0.1

    w_kch, b_2d = prepare_conv_params(weight, bias)   # one-time, not per call

    out = conv_extractor(x, w_kch, b_2d, kernel_size=K)
    out = jax.block_until_ready(out)

    ref = _reference(x, weight, bias, kernel_size=K)
    assert out.shape == (B, H)
    assert jnp.allclose(out, ref, atol=1e-5, rtol=1e-5), "mismatch vs reference"

    print("KERNEL_OK")
</pallas_src>

<mosaic_0001>
module attributes {stable_mosaic.version = 11 : i64} {
  func.func @_conv_extractor_kernel(%arg0: i32, %arg1: memref<2x8x4xf32, #tpu.memory_space<vmem>>, %arg2: memref<3x4x32xf32, #tpu.memory_space<vmem>>, %arg3: memref<1x32xf32, #tpu.memory_space<vmem>>, %arg4: memref<2x32xf32, #tpu.memory_space<vmem>>) attributes {dimension_semantics = [#tpu.dimension_semantics<parallel>], iteration_bounds = array<i64: 1>, scalar_prefetch = 0 : i64, scratch_operands = 0 : i64, tpu.core_type = #tpu.core_type<tc>, window_params = [{transform_indices = @transform_0, window_bounds = array<i64: 2, 8, 4>}, {pipeline_mode = #tpu.pipeline_mode<synchronous>, transform_indices = @transform_1, window_bounds = array<i64: 3, 4, 32>}, {pipeline_mode = #tpu.pipeline_mode<synchronous>, transform_indices = @transform_2, window_bounds = array<i64: 1, 32>}, {transform_indices = @transform_3, window_bounds = array<i64: 2, 32>}]} {
    %c0 = arith.constant 0 : index
    %c0_0 = arith.constant 0 : index
    %c0_1 = arith.constant 0 : index
    %0 = vector.load %arg1[%c0, %c0_0, %c0_1] : memref<2x8x4xf32, #tpu.memory_space<vmem>>, vector<2x8x4xf32>
    %cst = arith.constant dense<0.000000e+00> : vector<2x4xf32>
    %1 = vector.multi_reduction <add>, %0, %cst [1] : vector<2x8x4xf32> to vector<2x4xf32>
    %cst_2 = arith.constant 0.000000e+00 : f32
    %2 = vector.broadcast %cst_2 : f32 to vector<2x32xf32>
    %3 = vector.extract_strided_slice %0 {offsets = [0, 7, 0], sizes = [2, 1, 4], strides = [1, 1, 1]} : vector<2x8x4xf32> to vector<2x1x4xf32>
    %cst_3 = arith.constant dense<0.000000e+00> : vector<2x4xf32>
    %4 = vector.multi_reduction <add>, %3, %cst_3 [1] : vector<2x1x4xf32> to vector<2x4xf32>
    %5 = arith.subf %1, %4 : vector<2x4xf32>
    %c0_4 = arith.constant 0 : index
    %c0_5 = arith.constant 0 : index
    %c0_6 = arith.constant 0 : index
    %6 = vector.load %arg2[%c0_4, %c0_5, %c0_6] : memref<3x4x32xf32, #tpu.memory_space<vmem>>, vector<1x4x32xf32>
    %7 = vector.shape_cast %6 : vector<1x4x32xf32> to vector<4x32xf32>
    %cst_7 = arith.constant dense<0.000000e+00> : vector<2x32xf32>
    %8 = tpu.matmul %5, %7, %cst_7 {dimension_numbers = #tpu.dot_dimension_numbers<[1], [0], [0], [1], [0, 0, 1, 1], [], []>} : vector<2x4xf32>, vector<4x32xf32>, vector<2x32xf32> -> vector<2x32xf32>
    %9 = arith.addf %2, %8 : vector<2x32xf32>
    %c1 = arith.constant 1 : index
    %c0_8 = arith.constant 0 : index
    %c0_9 = arith.constant 0 : index
    %10 = vector.load %arg2[%c1, %c0_8, %c0_9] : memref<3x4x32xf32, #tpu.memory_space<vmem>>, vector<1x4x32xf32>
    %11 = vector.shape_cast %10 : vector<1x4x32xf32> to vector<4x32xf32>
    %cst_10 = arith.constant dense<0.000000e+00> : vector<2x32xf32>
    %12 = tpu.matmul %1, %11, %cst_10 {dimension_numbers = #tpu.dot_dimension_numbers<[1], [0], [0], [1], [0, 0, 1, 1], [], []>} : vector<2x4xf32>, vector<4x32xf32>, vector<2x32xf32> -> vector<2x32xf32>
    %13 = arith.addf %9, %12 : vector<2x32xf32>
    %14 = vector.extract_strided_slice %0 {offsets = [0, 0, 0], sizes = [2, 1, 4], strides = [1, 1, 1]} : vector<2x8x4xf32> to vector<2x1x4xf32>
    %cst_11 = arith.constant dense<0.000000e+00> : vector<2x4xf32>
    %15 = vector.multi_reduction <add>, %14, %cst_11 [1] : vector<2x1x4xf32> to vector<2x4xf32>
    %16 = arith.subf %1, %15 : vector<2x4xf32>
    %c2 = arith.constant 2 : index
    %c0_12 = arith.constant 0 : index
    %c0_13 = arith.constant 0 : index
    %17 = vector.load %arg2[%c2, %c0_12, %c0_13] : memref<3x4x32xf32, #tpu.memory_space<vmem>>, vector<1x4x32xf32>
    %18 = vector.shape_cast %17 : vector<1x4x32xf32> to vector<4x32xf32>
    %cst_14 = arith.constant dense<0.000000e+00> : vector<2x32xf32>
    %19 = tpu.matmul %16, %18, %cst_14 {dimension_numbers = #tpu.dot_dimension_numbers<[1], [0], [0], [1], [0, 0, 1, 1], [], []>} : vector<2x4xf32>, vector<4x32xf32>, vector<2x32xf32> -> vector<2x32xf32>
    %20 = arith.addf %13, %19 : vector<2x32xf32>
    %cst_15 = arith.constant 1.250000e-01 : f32
    %21 = vector.broadcast %cst_15 : f32 to vector<2x32xf32>
    %22 = arith.mulf %20, %21 : vector<2x32xf32>
    %c0_16 = arith.constant 0 : index
    %c0_17 = arith.constant 0 : index
    %23 = vector.load %arg3[%c0_16, %c0_17] : memref<1x32xf32, #tpu.memory_space<vmem>>, vector<1x32xf32>
    %24 = vector.broadcast %23 : vector<1x32xf32> to vector<2x32xf32>
    %25 = arith.addf %22, %24 : vector<2x32xf32>
    %c0_18 = arith.constant 0 : index
    %c0_19 = arith.constant 0 : index
    %26 = vector.load %arg4[%c0_18, %c0_19] : memref<2x32xf32, #tpu.memory_space<vmem>>, vector<2x32xf32>
    tpu.vector_store %arg4[%c0_18, %c0_19], %25 {strides = array<i32>} : memref<2x32xf32, #tpu.memory_space<vmem>>, vector<2x32xf32>,
    return
  }
  func.func @transform_0(%arg0: i32) -> (i32, i32, i32) {
    %c0_i32 = arith.constant 0 : i32
    %c0_i32_0 = arith.constant 0 : i32
    %c0_i32_1 = arith.constant 0 : i32
    return %arg0, %c0_i32, %c0_i32_0 : i32, i32, i32
  }
  func.func @transform_1(%arg0: i32) -> (i32, i32, i32) {
    %c0_i32 = arith.constant 0 : i32
    %c0_i32_0 = arith.constant 0 : i32
    %c0_i32_1 = arith.constant 0 : i32
    %c0_i32_2 = arith.constant 0 : i32
    return %c0_i32, %c0_i32_0, %c0_i32_1 : i32, i32, i32
  }
  func.func @transform_2(%arg0: i32) -> (i32, i32) {
    %c0_i32 = arith.constant 0 : i32
    %c0_i32_0 = arith.constant 0 : i32
    %c0_i32_1 = arith.constant 0 : i32
    return %c0_i32, %c0_i32_0 : i32, i32
  }
  func.func @transform_3(%arg0: i32) -> (i32, i32) {
    %c0_i32 = arith.constant 0 : i32
    %c0_i32_0 = arith.constant 0 : i32
    return %arg0, %c0_i32 : i32, i32
  }
}

</mosaic_0001>

<bundles_post_ra>
// kernel: tpu_custom_call.1
= control target key start
LH: loop header
LB: loop body
LE: loop exit
PB: predicated region body
PF: predicated region fallthrough
CT: control target
= control target key end

     0   :  { %vm45_vm0 = vcmask 1043456   ;;  %v364_v2 = vmov 0.0   ;;  %vm365_vm1 = vmmov 0   ;;  %vm17_vm2 = vcmask 31744   ;;  %s428_s0 = inlined_call_operand.vmem [shape: f32[2,8,4], index: 0, kind: input, shape index: {}]   ;;  %s429_s1 = inlined_call_operand.vmem [shape: f32[3,4,32], index: 1, kind: input, shape index: {}]   ;;  %s430_s2 = inlined_call_operand.vmem [shape: f32[1,32], index: 2, kind: input, shape index: {}]   ;;  %s431_s3 = inlined_call_operand.hbm [shape: f32[2,32], index: 3, kind: output, shape index: {}]  }
   0x1   :  { %v36_v0 = vld [vmem:[%s429_s1] sm:$0xf]  ;;  %324 = vmatprep.subr.mxu0 %v364_v2  ;;  %326 = vmatprep.mubr.msk.f32.mxu0 %vm365_vm1, %v364_v2  ;;  %v16_v3 = vld [vmem:[%s428_s0 + $0x8] sm:$0xff]  ;;  %v304_v6 = vld [vmem:[%s429_s1 + $0x4] sm:$0xf] }
   0x2   :  { %v15_v1 = vld [vmem:[%s428_s0] sm:$0xff]  ;;  %325 = vmatpush3.msk.msra.mxu0 %vm45_vm0, %v36_v0  ;;  %v25_v5 = vsel %vm17_vm2, %v16_v3, 0.0  ;;  %319 = vmatprep.subr.mxu1 %v364_v2 }
   0x3   :  { %v18_v4 = vsel %vm17_vm2, %v15_v1, 0.0 }
   0x4   :  { %8 = vsyncpa [#allocation3], 0  ;;  %329 = vmatprep.subr.mxu0 %v364_v2  ;;  %v19_v7 = vrot.slane %v18_v4, 4  ;;  %v26_v8 = vrot.slane %v25_v5, 4  ;;  %320 = vmatpush3.msk.msra.mxu1 %vm45_vm0, %v304_v6  ;;  %vm41_vm3 = vcmask 1041409   ;;  %vm288_vm4 = vcmask 254976  }
   0x5   :  { %321 = vmatprep.mubr.msk.f32.mxu1 %vm365_vm1, %v364_v2  ;;  %v309_v24 = vld [vmem:[%s429_s1 + $0x8] sm:$0xf]  ;;  %v312_v33 = vld [vmem:[%s430_s2] ss:$0 sm:$0xff]  ;;  %s366_s1 = smov [#allocation2]  }
   0x6   :  { %v20_v9 = vadd.f32 %v19_v7, %v18_v4  ;;  %v27_v10 = vadd.f32 %v26_v8, %v25_v5  ;;  %s296_s23 = sshll.u32 %s366_s1, 4  ;;  %s297_s23 = int_to_ptr.vmem [resolvable:$true] %s296_s23 }
   0x7   :  { %s340_s24 = scalar_lea.vmem %s297_s23, 32  ;;  %p345_p1 = scmp.lt.s32.totalorder %s297_s23, %s297_s23 }
   0x8   :  { %v21_v11 = vrot.slane %v20_v9, 2  ;;  %v28_v12 = vrot.slane %v27_v10, 2  ;;  %p341_p0 = scmp.ne.s32.totalorder %s297_s23, %s340_s24  ;;  %p346_p2 = scmp.lt.s32.totalorder %s340_s24, %s340_s24 }
   0xa   :  { %v22_v13 = vadd.f32 %v21_v11, %v20_v9  ;;  %v29_v14 = vadd.f32 %v28_v12, %v27_v10  ;;  %p347_p3 = por %p346_p2, %p345_p1 }
   0xc   :  { %v23_v15 = vrot.slane %v22_v13, 1  ;;  %v30_v16 = vrot.slane %v29_v14, 1  ;;  %p348_p4 = pnand %p347_p3, %p341_p0 }
   0xe   :  { %v24_v17 = vadd.f32 %v23_v15, %v22_v13  ;;  %v31_v18 = vadd.f32 %v30_v16, %v29_v14 }
  0x10   :  { %v34_v19 = vsub.f32 %v24_v17, %v15_v1  ;;  %v35_v20 = vsub.f32 %v31_v18, %v16_v3  ;;  %v42_v21 = vsel %vm41_vm3, %v31_v18, %v24_v17 }
  0x11   :  { %322 = vmatmul.mubr.msk.f32.vlgmr.msra.gmra.mrb[0].mxu1 %vm17_vm2, %v42_v21 }
  0x12   :  { %v121_v22 = vrot.slane %v34_v19, 7  ;;  %v122_v23 = vrot.slane %v35_v20, 6  ;;  %v201_v26 = vrot.slane %v35_v20, 7 }
  0x14   :  { %v123_v25 = vsel %vm41_vm3, %v122_v23, %v121_v22  ;;  %v202_v27 = vsel %vm41_vm3, %v201_v26, %v34_v19 }
  0x15   :  { %327 = vmatmul.mubr.msk.f32.vlgmr.msra.gmra.mrb[0].mxu0 %vm17_vm2, %v123_v25 }
  0x16   :  { %330 = vmatpush3.msk.msra.mxu0 %vm45_vm0, %v309_v24  ;;  %331 = vmatprep.mubr.msk.f32.mxu0 %vm365_vm1, %v364_v2 }
  0x1d   :  { %332 = vmatmul.mubr.msk.f32.vlgmr.msra.gmra.mrb[0].mxu0 %vm17_vm2, %v202_v27 }
  0xe4   :  { %v115_v28 = vpop.f32.mrb[0].mxu1 }
  0xe5   :  { %v323_v29 = vpop.f32.mrb[1].mxu1 }
  0xf0   :  { %v274_v30 = vpop.f32.mrb[0].mxu0 }
  0xf1   :  { %v334_v31 = vadd.f32 %v274_v30, %v115_v28  ;;  %v333_v32 = vpop.f32.mrb[1].mxu0 }
  0xf3   :  { %v279_v34 = vmul.f32 0.125, %v334_v31 }
  0xf5   :  { %v287_v35 = vadd.f32 %v312_v33, %v279_v34 }
  0xf7   :  { %289 = vst.msk [vmem:[#allocation2] sm:$0x3] %vm288_vm4, %v287_v35 }
  0xf8   :  { %351 = shalt.err (!%p348_p4)
}
  0xf9   :  { %s352_s27 = scalar_lea.hbm %s431_s3, 32 }
  0xfa   :  { %p353_p5 = scmp.ne.s32.totalorder %s431_s3, %s352_s27  ;;  %p356_p6 = scmp.lt.u32.totalorder %s352_s27, %s431_s3 }
  0xfc   :  { %p358_p7 = pnand %p356_p6, %p353_p5 }
  0xfe   :  { %361 = shalt.err (!%p358_p7)
}
  0xff   :  { %299 = dma.vmem_to_hbm [thread:$0]  %s297_s23, 32, %s431_s3, [#allocation3]  }
 0x100   :  { %362 = dma.done.wait [#allocation3], 32  }
 0x101   :  { %363 = vsyncadd [#allocation3], 4294967264 }
 0x102   :  { %303 = vsyncpa [#allocation3], 1 }

</bundles_post_ra>
